<compile_context>
chip_gen: v5e
topology: v5e:2x2
jax: 0.10.0
libtpu: 0.0.40
codegen_flags: <defaults>
</compile_context>

<pallas_src>
import jax
import jax.numpy as jnp
from jax.experimental import pallas as pl
from jax.experimental.pallas import tpu as pltpu

LANE = 128
SUBLANE = 8


def fc_kernel(x_ref, w1_ref, b1_ref, w2_ref, b2_ref, o_ref):
    # x_ref:  (tb, F)  bf16     w1_ref: (F, H)  bf16     b1_ref: (1, H)  f32
    # w2_ref: (H, Cp)  bf16     b2_ref: (1, Cp) f32      o_ref:  (tb, Cp) f32
    x = x_ref[...]
    h = jnp.dot(x, w1_ref[...], preferred_element_type=jnp.float32)   # MXU, f32 acc
    h = jnp.maximum(h + b1_ref[...], 0.0)                             # bias + ReLU in f32 (VPU)
    # Dropout: identity (eval mode)
    y = jnp.dot(h.astype(w2_ref.dtype), w2_ref[...],
                preferred_element_type=jnp.float32)
    o_ref[...] = (y + b2_ref[...]).astype(o_ref.dtype)                # lane-dense (Cp=128) store


def fc_prepare_params(w1, b1, w2, b2):
    """One-time weight transform (transpose + lane-padding + bf16 cast) done outside the hot path.

    PyTorch layout in: w1 [H, F], b1 [H], w2 [C, H], b2 [C].
    """
    H, F = w1.shape
    C = w2.shape[0]
    Cp = ((C + LANE - 1) // LANE) * LANE          # pad class dim up to a multiple of 128

    w1_t = jnp.asarray(w1, jnp.float32).T.astype(jnp.bfloat16)        # (F, H)
    b1_2d = jnp.asarray(b1, jnp.float32).reshape(1, H)                # (1, H)
    w2_pad = jnp.zeros((H, Cp), jnp.bfloat16)
    w2_pad = w2_pad.at[:, :C].set(jnp.asarray(w2, jnp.float32).T.astype(jnp.bfloat16))
    b2_pad = jnp.zeros((1, Cp), jnp.float32)
    b2_pad = b2_pad.at[:, :C].set(jnp.asarray(b2, jnp.float32).reshape(1, C))
    return {"w1_t": w1_t, "b1": b1_2d, "w2_t": w2_pad, "b2": b2_pad, "num_classes": C}


def fc_forward(x, params, *, block_b=None):
    """x: [B, F]. Returns [B, num_classes] float32 (eval-mode forward)."""
    B, F = x.shape
    w1_t, b1_2d, w2_t, b2_2d = params["w1_t"], params["b1"], params["w2_t"], params["b2"]
    C = params["num_classes"]
    H = w1_t.shape[1]
    Cp = w2_t.shape[1]

    # Batch tile: cap at 512 rows, force a multiple of 8 (sublane alignment).
    if block_b is None:
        block_b = min(B, 512)
    block_b = max(SUBLANE, (block_b // SUBLANE) * SUBLANE)

    # Pad the batch so the grid divides evenly (padded rows are sliced off afterwards).
    Bp = ((B + block_b - 1) // block_b) * block_b
    xb = x.astype(jnp.bfloat16)
    if Bp != B:
        xb = jnp.pad(xb, ((0, Bp - B), (0, 0)))

    grid = (Bp // block_b,)

    # VMEM budget: double-buffered x tile + double-buffered padded output tile + weights, with headroom.
    est = (2 * block_b * F * 2          # x (bf16), 2 buffers
           + 2 * block_b * Cp * 4       # out (f32), 2 buffers
           + 2 * (F * H * 2 + H * 4 + H * Cp * 2 + Cp * 4))  # weights/biases (resident, 2 bufs worst case)
    vmem_limit = int(min(max(2 * est + (1 << 20), 4 << 20), 64 << 20))

    cost = pl.CostEstimate(
        flops=2 * Bp * (F * H + H * Cp),
        transcendentals=0,
        bytes_accessed=Bp * F * 2 + Bp * Cp * 4 + F * H * 2 + H * 4 + H * Cp * 2 + Cp * 4,
    )

    out_padded = pl.pallas_call(
        fc_kernel,
        out_shape=jax.ShapeDtypeStruct((Bp, Cp), jnp.float32),
        grid_spec=pltpu.PrefetchScalarGridSpec(
            num_scalar_prefetch=0,
            grid=grid,
            in_specs=[
                pl.BlockSpec((block_b, F), lambda i: (i, 0)),   # x tile (pipelined over batch)
                pl.BlockSpec((F, H),       lambda i: (0, 0)),   # W1 (full, resident)
                pl.BlockSpec((1, H),       lambda i: (0, 0)),   # b1
                pl.BlockSpec((H, Cp),      lambda i: (0, 0)),   # W2 (lane-padded)
                pl.BlockSpec((1, Cp),      lambda i: (0, 0)),   # b2 (lane-padded)
            ],
            out_specs=pl.BlockSpec((block_b, Cp), lambda i: (i, 0)),   # lane-dense output
        ),
        compiler_params=pltpu.CompilerParams(
            dimension_semantics=("parallel",),
            vmem_limit_bytes=vmem_limit,
        ),
        cost_estimate=cost,
    )(xb, w1_t, b1_2d, w2_t, b2_2d)

    return out_padded[:B, :C]


def _init_params(key, input_size, hidden, num_classes, bias=True):
    """Deterministic init mimicking nn.Linear default (uniform +/- 1/sqrt(fan_in))."""
    k1, k2, k3, k4 = jax.random.split(key, 4)
    lim1 = 1.0 / jnp.sqrt(jnp.float32(input_size))
    lim2 = 1.0 / jnp.sqrt(jnp.float32(hidden))
    w1 = jax.random.uniform(k1, (hidden, input_size), jnp.float32, -lim1, lim1)
    b1 = (jax.random.uniform(k2, (hidden,), jnp.float32, -lim1, lim1)
          if bias else jnp.zeros((hidden,), jnp.float32))
    w2 = jax.random.uniform(k3, (num_classes, hidden), jnp.float32, -lim2, lim2)
    b2 = (jax.random.uniform(k4, (num_classes,), jnp.float32, -lim2, lim2)
          if bias else jnp.zeros((num_classes,), jnp.float32))
    return w1, b1, w2, b2


if __name__ == "__main__":
    key = jax.random.PRNGKey(0)
    kx, kp = jax.random.split(key)

    batch = 64
    input_size = 64      # representation_size
    hidden = 32
    num_classes = 10
    bias = True

    x = jax.random.normal(kx, (batch, input_size), jnp.float32)
    w1, b1, w2, b2 = _init_params(kp, input_size, hidden, num_classes, bias)

    params = fc_prepare_params(w1, b1, w2, b2)   # one-time transpose/pad/cast
    out = fc_forward(x, params, block_b=16)      # multi-step batch grid (4 tiles of 16 rows)
    out = jax.block_until_ready(out)

    # Pure-JAX f32 reference (eval-mode dropout = identity). bf16 MXU inputs => loose tolerance.
    ref = jnp.maximum(x @ w1.T + b1, 0.0) @ w2.T + b2
    assert out.shape == (batch, num_classes)
    assert jnp.allclose(out, ref, atol=5e-2, rtol=5e-2), float(jnp.max(jnp.abs(out - ref)))

    print("KERNEL_OK")
</pallas_src>

<mosaic_0001>
module attributes {stable_mosaic.version = 11 : i64} {
  func.func @fc_kernel(%arg0: i32, %arg1: memref<16x64xbf16, #tpu.memory_space<vmem>>, %arg2: memref<64x32xbf16, #tpu.memory_space<vmem>>, %arg3: memref<1x32xf32, #tpu.memory_space<vmem>>, %arg4: memref<32x128xbf16, #tpu.memory_space<vmem>>, %arg5: memref<1x128xf32, #tpu.memory_space<vmem>>, %arg6: memref<16x128xf32, #tpu.memory_space<vmem>>) attributes {dimension_semantics = [#tpu.dimension_semantics<parallel>], iteration_bounds = array<i64: 4>, scalar_prefetch = 0 : i64, scratch_operands = 0 : i64, tpu.core_type = #tpu.core_type<tc>, window_params = [{transform_indices = @transform_0, window_bounds = array<i64: 16, 64>}, {pipeline_mode = #tpu.pipeline_mode<synchronous>, transform_indices = @transform_1, window_bounds = array<i64: 64, 32>}, {pipeline_mode = #tpu.pipeline_mode<synchronous>, transform_indices = @transform_2, window_bounds = array<i64: 1, 32>}, {pipeline_mode = #tpu.pipeline_mode<synchronous>, transform_indices = @transform_3, window_bounds = array<i64: 32, 128>}, {pipeline_mode = #tpu.pipeline_mode<synchronous>, transform_indices = @transform_4, window_bounds = array<i64: 1, 128>}, {transform_indices = @transform_5, window_bounds = array<i64: 16, 128>}]} {
    %c0 = arith.constant 0 : index
    %c0_0 = arith.constant 0 : index
    %0 = vector.load %arg1[%c0, %c0_0] : memref<16x64xbf16, #tpu.memory_space<vmem>>, vector<16x64xbf16>
    %c0_1 = arith.constant 0 : index
    %c0_2 = arith.constant 0 : index
    %1 = vector.load %arg2[%c0_1, %c0_2] : memref<64x32xbf16, #tpu.memory_space<vmem>>, vector<64x32xbf16>
    %cst = arith.constant dense<0.000000e+00> : vector<16x32xf32>
    %2 = tpu.matmul %0, %1, %cst {dimension_numbers = #tpu.dot_dimension_numbers<[1], [0], [0], [1], [0, 0, 1, 1], [], []>} : vector<16x64xbf16>, vector<64x32xbf16>, vector<16x32xf32> -> vector<16x32xf32>
    %c0_3 = arith.constant 0 : index
    %c0_4 = arith.constant 0 : index
    %3 = vector.load %arg3[%c0_3, %c0_4] : memref<1x32xf32, #tpu.memory_space<vmem>>, vector<1x32xf32>
    %4 = vector.broadcast %3 : vector<1x32xf32> to vector<16x32xf32>
    %5 = arith.addf %2, %4 : vector<16x32xf32>
    %cst_5 = arith.constant 0.000000e+00 : f32
    %6 = vector.broadcast %cst_5 : f32 to vector<16x32xf32>
    %7 = arith.maximumf %5, %6 : vector<16x32xf32>
    %8 = arith.truncf %7 : vector<16x32xf32> to vector<16x32xbf16>
    %c0_6 = arith.constant 0 : index
    %c0_7 = arith.constant 0 : index
    %9 = vector.load %arg4[%c0_6, %c0_7] : memref<32x128xbf16, #tpu.memory_space<vmem>>, vector<32x128xbf16>
    %cst_8 = arith.constant dense<0.000000e+00> : vector<16x128xf32>
    %10 = tpu.matmul %8, %9, %cst_8 {dimension_numbers = #tpu.dot_dimension_numbers<[1], [0], [0], [1], [0, 0, 1, 1], [], []>} : vector<16x32xbf16>, vector<32x128xbf16>, vector<16x128xf32> -> vector<16x128xf32>
    %c0_9 = arith.constant 0 : index
    %c0_10 = arith.constant 0 : index
    %11 = vector.load %arg5[%c0_9, %c0_10] : memref<1x128xf32, #tpu.memory_space<vmem>>, vector<1x128xf32>
    %12 = vector.broadcast %11 : vector<1x128xf32> to vector<16x128xf32>
    %13 = arith.addf %10, %12 : vector<16x128xf32>
    %c0_11 = arith.constant 0 : index
    %c0_12 = arith.constant 0 : index
    %14 = vector.load %arg6[%c0_11, %c0_12] : memref<16x128xf32, #tpu.memory_space<vmem>>, vector<16x128xf32>
    tpu.vector_store %arg6[%c0_11, %c0_12], %13 {strides = array<i32>} : memref<16x128xf32, #tpu.memory_space<vmem>>, vector<16x128xf32>,
    return
  }
  func.func @transform_0(%arg0: i32) -> (i32, i32) {
    %c0_i32 = arith.constant 0 : i32
    %c0_i32_0 = arith.constant 0 : i32
    return %arg0, %c0_i32 : i32, i32
  }
  func.func @transform_1(%arg0: i32) -> (i32, i32) {
    %c0_i32 = arith.constant 0 : i32
    %c0_i32_0 = arith.constant 0 : i32
    %c0_i32_1 = arith.constant 0 : i32
    return %c0_i32, %c0_i32_0 : i32, i32
  }
  func.func @transform_2(%arg0: i32) -> (i32, i32) {
    %c0_i32 = arith.constant 0 : i32
    %c0_i32_0 = arith.constant 0 : i32
    %c0_i32_1 = arith.constant 0 : i32
    return %c0_i32, %c0_i32_0 : i32, i32
  }
  func.func @transform_3(%arg0: i32) -> (i32, i32) {
    %c0_i32 = arith.constant 0 : i32
    %c0_i32_0 = arith.constant 0 : i32
    %c0_i32_1 = arith.constant 0 : i32
    return %c0_i32, %c0_i32_0 : i32, i32
  }
  func.func @transform_4(%arg0: i32) -> (i32, i32) {
    %c0_i32 = arith.constant 0 : i32
    %c0_i32_0 = arith.constant 0 : i32
    %c0_i32_1 = arith.constant 0 : i32
    return %c0_i32, %c0_i32_0 : i32, i32
  }
  func.func @transform_5(%arg0: i32) -> (i32, i32) {
    %c0_i32 = arith.constant 0 : i32
    %c0_i32_0 = arith.constant 0 : i32
    return %arg0, %c0_i32 : i32, i32
  }
}

</mosaic_0001>

<bundles_post_ra>
// kernel: tpu_custom_call.1
= control target key start
LH: loop header
LB: loop body
LE: loop exit
PB: predicated region body
PF: predicated region fallthrough
CT: control target
= control target key end

     0   :  { %10 = vsyncpa [#allocation3], 0  ;;  %s706_s0 = inlined_call_operand.vmem [shape: bf16[64,64], index: 0, kind: input, shape index: {}]   ;;  %s707_s1 = inlined_call_operand.vmem [shape: bf16[64,32], index: 1, kind: input, shape index: {}]   ;;  %s708_s2 = inlined_call_operand.vmem [shape: f32[1,32], index: 2, kind: input, shape index: {}]   ;;  %s709_s3 = inlined_call_operand.vmem [shape: bf16[32,128], index: 3, kind: input, shape index: {}]   ;;  %s710_s4 = inlined_call_operand.vmem [shape: f32[1,128], index: 4, kind: input, shape index: {}]   ;;  %s711_s5 = inlined_call_operand.hbm [shape: f32[64,128], index: 5, kind: output, shape index: {}]  }
   0x1   :  { %12 = vsyncpa [#allocation3 + $0x1], 0  ;;  %s598_s18 = smov 0   ;;  %s600_s19 = smov 0  }
   0x2   :  { %s602_s20 = smov 0   ;;  %s604_s21 = smov 0  }
   0x3 LB: > { %s619_s22 = sadd.s32 4294967295, %s564_s21   ;;  %s409_s23 = sadd.s32 4294967294, %s564_s21   ;;  %s564_s21 = sphi %s604_s21, %s717_s21   ;;  %s560_s20 = sphi %s602_s20, %s716_s20   ;;  %s556_s19 = sphi %s600_s19, %s715_s19   ;;  %s552_s18 = sphi %s598_s18, %s714_s18  }
   0x4   : > { %s623_s24 = sadd.s32 1, %s564_s21   ;;  %s135_s25 = sadd.s32 1, %s560_s20 }
   0x5   : > { %s132_s26 = ssub.s32 %s564_s21, %s623_s24  ;;  %p145_p0 = scmp.ne.s32.totalorder %s560_s20, %s556_s19 }
   0x6   : > { %p133_p1 = scmp.eq.s32.totalorder %s132_s26, 0  ;;  %p146_p2 = scmp.eq.s32.totalorder %s619_s22, 3 }
   0x7   : > { %p151_p3 = scmp.ne.s32.totalorder %s556_s19, %s552_s18  ;;  %p152_p4 = scmp.eq.s32.totalorder %s409_s23, 3 }
   0x8   : > { %s634_s27 = scalar_select %p133_p1, %s560_s20, %s135_s25  }
   0x9   : > { %p636_p5 = por %p146_p2, %p145_p0  ;;  %p640_p6 = por %p152_p4, %p151_p3 }
   0xa   : > { %p412_p7 = scmp.ge.s32.totalorder %s564_s21, 1  ;;  %p191_p8 = scmp.lt.s32.totalorder %s564_s21, 5 }
   0xc   : > { %p192_p9 = pnand %p412_p7, %p191_p8 }
   0xd   : > { %s414_s7 = sshll.u32 (!%p192_p9), %s619_s22, 1  ;;  %s216_s8 = sand.u32 (!%p192_p9), 1, %s556_s19  }
   0xe   : > { %195 = sbr.rel (%p192_p9) target bundleno = 315 (0x13b), region = 40  ;;  %p220_p10 = scmp.lt.s32.totalorder (!%p192_p9), %s414_s7, 7 }
   0xf   : > { %s413_s9 = sshll.u32 (!%p192_p9), %s216_s8, 4  ;;  %s332_s25 = scalar_lea.sflag (!%p192_p9), [#allocation3], %s216_s8 }
  0x10   : > { %s218_s16 = scalar_lea.vmem (!%p192_p9), [#allocation2], %s413_s9 }
  0x13   : > { %v455_v0 = vld [vmem:[%s707_s1 + $0x18] sm:$0xff]  ;;  %v454_v1 = vld [vmem:[%s707_s1 + $0x10] sm:$0xff]  ;;  %s719_s7 = smov (!%p220_p10, %s414_s7), 7  ;;  %v453_v2 = vld [vmem:[%s707_s1 + $0x8] sm:$0xff]  ;;  %vm270_vm0 = vcmask 523264   ;;  %vm311_vm1 = vcmask 261120  }
  0x14   : > { %278 = vmatpush.bf16.msra.mxu0 %v455_v0  ;;  %s415_s12 = sshll.u32 %s719_s7, 2  ;;  %v452_v3 = vld [vmem:[%s707_s1] sm:$0xff]  ;;  %v457_v5 = vld [vmem:[%s709_s3 + $0x8] sm:$0xff]  ;;  %s522_s7 = scalar_lea.hbm %s711_s5, 64 }
  0x15   : > { %s223_s17 = scalar_lea.vmem %s706_s0, %s415_s12  ;;  %321 = vmatpush.bf16.msra.mxu1 %v457_v5  ;;  %v456_v6 = vld [vmem:[%s709_s3] sm:$0xff]  ;;  %s458_s12 = sshll.u32 %s619_s22, 4 }
  0x16   : > { %v451_v4 = vld [vmem:[%s223_s17] sm:$0xff]  ;;  %s343_s15 = scalar_lea.hbm %s711_s5, %s458_s12  ;;  %s344_s17 = sshll.u32 %s218_s16, 4  ;;  %s345_s17 = int_to_ptr.vmem [resolvable:$true] %s344_s17 }
  0x17   : > { %v500_v8 = vld [vmem:[%s708_s2] ss:$0 sm:$0xff]  ;;  %s346_s23 = sshll.u32 %s343_s15, 4  ;;  %s347_s23 = int_to_ptr.hbm [resolvable:$true] %s346_s23 }
  0x18   : > { %279 = vmatpush.bf16.msra.mxu0 %v454_v1  ;;  %v501_v15 = vld [vmem:[%s710_s4] ss:$0 sm:$0xff]  ;;  %s516_s26 = sshra.s32 %s347_s23, 4  ;;  %s517_s26 = int_to_ptr.hbm [resolvable:$true] %s516_s26 }
  0x19   : > { %322 = vmatpush.bf16.msra.mxu1 %v456_v6  ;;  %s518_s22 = scalar_lea.hbm %s517_s26, 16  ;;  %p523_p0 = scmp.lt.s32.totalorder %s517_s26, %s711_s5 }
  0x1a   : > { %p519_p11 = scmp.ne.s32.totalorder %s517_s26, %s518_s22  ;;  %p524_p1 = scmp.lt.s32.totalorder %s522_s7, %s518_s22 }
  0x1c   : > { %280 = vmatpush.bf16.msra.mxu0 %v453_v2  ;;  %p520_p12 = pnand %p519_p11, %p636_p5  ;;  %p525_p2 = por %p524_p1, %p523_p0 }
  0x1e   : > { %p521_p13 = pneg %p520_p12 }
  0x20   : > { %281 = vmatpush.bf16.msra.mxu0 %v452_v3  ;;  %p526_p3 = pnand %p525_p2, %p521_p13 }
  0x23   : > { %436 = vmatmul.msk.bf16.vlgmr.msra.gmra.mxu0 %vm270_vm0, %v451_v4 }
  0xa0   : > { %v283_v7 = vpop.f32.mrf.mxu0 }
  0xa1   : > { %v284_v9 = vadd.f32 %v500_v8, %v283_v7 }
  0xa3   : > { %v288_v12 = vmax.f32 %v284_v9, 0.0 }
  0xa8   : > { %v285_v10 = vpop.f32.mrf.mxu0 }
  0xa9   : > { %v286_v11 = vadd.f32 %v500_v8, %v285_v10 }
  0xab   : > { %v289_v13 = vmax.f32 %v286_v11, 0.0 }
  0xad   : > { %v290_v14 = vpack.c.bf16 %v289_v13, %v288_v12 }
  0xaf   : > { %445 = vmatmul.msk.bf16.vlgmr.msra.gmra.mxu1 %vm311_vm1, %v290_v14 }
 0x12c   : > { %v324_v16 = vpop.f32.mrf.mxu1 }
 0x12d   : > { %v325_v17 = vadd.f32 %v501_v15, %v324_v16 }
 0x12f   : > { %329 = vst [vmem:[%s218_s16] sm:$0xff] %v325_v17 }
 0x134   : > { %v326_v18 = vpop.f32.mrf.mxu1 }
 0x135   : > { %v327_v19 = vadd.f32 %v501_v15, %v326_v18 }
 0x137   : > { %330 = vst [vmem:[%s218_s16 + $0x8] sm:$0xff] %v327_v19 }
 0x138   : > { %529 = shalt.err (!%p526_p3)
}
 0x139   : > { %s566_s8 = smov 128   ;;  %s567_s11 = smov 8  }
 0x13a   : > { %459 = dma.vmem_to_hbm [thread:$0]  (%p636_p5), %s345_s17, 256, %s347_s23, %s332_s25, %s566_s8, %s566_s8, %s567_s11  }
 0x13b PF: > { %p465_p4 = scmp.ge.s32.totalorder %s564_s21, 2  ;;  %s361_s12 = sand.u32 1, %s552_s18  }
 0x13c   : > { %s362_s13 = scalar_lea.sflag [#allocation3], %s361_s12 }
 0x13d   : > { %p462_p7 = pnand %p465_p4, %p640_p6 }
 0x13f   : > { %p463_p8 = pneg %p462_p7 }
 0x141   : > { %547 = dma.done.wait (%p463_p8), %s362_s13, 256  }
 0x142   : > { %549 = vsyncadd (%p463_p8), %s362_s13, 4294967040  ;;  %p15_p9 = scmp.ge.s32.totalorder %s623_s24, 6   ;;  %s714_s18 = smov %s556_s19 }
 0x143   : > { %s715_s19 = smov %s560_s20  ;;  %s716_s20 = smov %s634_s27 }
 0x144   : > { %s717_s21 = smov %s623_s24  ;;  %17 = sbr.rel (!%p15_p9) target bundleno = 3 (0x3), region = 75 }
 0x149   :  { %368 = vsyncpa [#allocation3], 1 }
 0x14a   :  { %370 = vsyncpa [#allocation3 + $0x1], 1 }

</bundles_post_ra>
